<compile_context>
chip_gen: v7x
topology: tpu7x:2x2x1
jax: 0.10.0
libtpu: 0.0.40
codegen_flags: <defaults>
</compile_context>

<pallas_src>
import functools
import jax
import jax.numpy as jnp
from jax.experimental import pallas as pl
from jax.experimental.pallas import tpu as pltpu


def _round_up(x, m):
    return pl.cdiv(x, m) * m


# ----------------------------------------------------------------------------
# Pallas kernels: fused MLM-decoder matmul + Splade pooling
# ----------------------------------------------------------------------------
def splade_head_kernel_2d(h_ref, w_ref, bias_ref, mask_ref, tok_ref, sent_ref):
    # grid = (cdiv(V, tv), B); whole (padded) sequence in a single tile, so no
    # reduction axis and no accumulator phases.
    h = h_ref[0]                                              # (ts, H) bf16
    logits = jnp.dot(h, w_ref[...], preferred_element_type=jnp.float32)
    logits = logits + bias_ref[...]                           # (ts, tv) f32
    tok_ref[0] = logits.astype(tok_ref.dtype)                 # bf16 HBM write
    splade = jnp.log1p(jnp.maximum(logits, 0.0)) * mask_ref[0]
    sent_ref[0] = splade.max(axis=0, keepdims=True)


def splade_head_kernel_3d(h_ref, w_ref, bias_ref, mask_ref, tok_ref, sent_ref):
    # grid = (cdiv(V, tv), B, S_pad // ts); seq (max-reduction) axis last.
    # sent_ref's block index is constant across the seq axis, so the output
    # block stays VMEM-resident and doubles as the running-max accumulator.
    k = pl.program_id(2)

    @pl.when(k == 0)
    def _():
        # splade values are >= 0, so 0 is a valid identity for the max.
        sent_ref[...] = jnp.zeros_like(sent_ref)

    h = h_ref[0]                                              # (ts, H) bf16
    logits = jnp.dot(h, w_ref[...], preferred_element_type=jnp.float32)
    logits = logits + bias_ref[...]
    tok_ref[0] = logits.astype(tok_ref.dtype)
    splade = jnp.log1p(jnp.maximum(logits, 0.0)) * mask_ref[0]
    sent_ref[0] = jnp.maximum(sent_ref[0], splade.max(axis=0, keepdims=True))


def splade_mlm_head(hidden, w_dec, b_dec, attention_mask, *,
                    max_tv=2048, max_ts=256, token_dtype=jnp.bfloat16):
    """hidden: [B,S,H] f32, w_dec: [H,V], b_dec: [V], attention_mask: [B,S].

    Returns (token_embeddings [B,S,V] token_dtype, sentence_embedding [B,V] f32).
    NOTE: token_embeddings default to bf16 (documented fidelity delta vs. the
    f32 PyTorch MLM decoder); pass token_dtype=jnp.float32 for full precision.
    """
    B, S, H = hidden.shape
    V = w_dec.shape[1]

    # ---- tile sizes: lane dim multiple of 128, sublane multiple of 8/16 -----
    tv = min(_round_up(max_tv, 128), _round_up(V, 128))
    V_pad = _round_up(V, tv)
    ts = min(_round_up(max_ts, 16), _round_up(S, 8))
    S_pad = _round_up(S, ts)
    n_vtiles = V_pad // tv
    n_stiles = S_pad // ts

    # ---- operand padding (outputs stay exact-shaped; ragged edges masked) ---
    # Weight/bias vocab padding fuses with the bf16 cast below (~free);
    # seq padding is zeros so padded rows contribute 0 to the Splade max.
    if V_pad != V:
        w_dec = jnp.pad(w_dec, ((0, 0), (0, V_pad - V)))
        b_dec = jnp.pad(b_dec, (0, V_pad - V))
    if S_pad != S:
        hidden = jnp.pad(hidden, ((0, 0), (0, S_pad - S), (0, 0)))
        attention_mask = jnp.pad(attention_mask.astype(jnp.float32),
                                 ((0, 0), (0, S_pad - S)))

    # bf16 matmul inputs (f32 MXU accumulation in-kernel); epilogue stays f32.
    h_bf = hidden.astype(jnp.bfloat16)
    w_bf = w_dec.astype(jnp.bfloat16)
    bias2d = b_dec.astype(jnp.float32).reshape(1, V_pad)
    mask3d = attention_mask.astype(jnp.float32).reshape(B, S_pad, 1)

    tok_bytes = jnp.dtype(token_dtype).itemsize
    out_shape = (
        jax.ShapeDtypeStruct((B, S, V), token_dtype),     # token_embeddings
        jax.ShapeDtypeStruct((B, 1, V), jnp.float32),     # sentence_embedding
    )

    # Per-step VMEM (double-buffered ins/outs) + headroom, capped well under
    # v7x's 64 MiB physical VMEM.
    tile_bytes = 2 * (ts * H * 2 + H * tv * 2 + tv * 4 + ts * 4)     # inputs
    tile_bytes += 2 * (ts * tv * tok_bytes + tv * 4)                 # outputs
    vmem_limit = int(min(48 * 2**20, max(16 * 2**20, 2 * tile_bytes + (4 << 20))))

    cost = pl.CostEstimate(
        flops=int(2 * B * S_pad * H * V_pad),
        transcendentals=int(B * S_pad * V_pad),
        bytes_accessed=int(n_vtiles * B * S_pad * (H * 2 + 4)   # hidden+mask re-reads
                           + H * V_pad * 2 + V_pad * 4          # weights + bias
                           + B * S_pad * V_pad * tok_bytes      # token_embeddings
                           + B * V_pad * 4))                    # sentence_embedding

    if n_stiles == 1:
        token_emb, sent_emb = pl.pallas_call(
            splade_head_kernel_2d,
            out_shape=out_shape,
            grid_spec=pltpu.PrefetchScalarGridSpec(
                num_scalar_prefetch=0,
                grid=(n_vtiles, B),
                in_specs=[
                    pl.BlockSpec((1, ts, H), lambda j, b: (b, 0, 0)),   # hidden
                    pl.BlockSpec((H, tv),    lambda j, b: (0, j)),      # w_dec
                    pl.BlockSpec((1, tv),    lambda j, b: (0, j)),      # bias
                    pl.BlockSpec((1, ts, 1), lambda j, b: (b, 0, 0)),   # mask
                ],
                out_specs=[
                    pl.BlockSpec((1, ts, tv), lambda j, b: (b, 0, j)),  # token_emb
                    pl.BlockSpec((1, 1, tv),  lambda j, b: (b, 0, j)),  # sent_emb
                ],
            ),
            compiler_params=pltpu.CompilerParams(
                dimension_semantics=("parallel", "parallel"),
                vmem_limit_bytes=vmem_limit),
            cost_estimate=cost,
        )(h_bf, w_bf, bias2d, mask3d)
    else:
        token_emb, sent_emb = pl.pallas_call(
            splade_head_kernel_3d,
            out_shape=out_shape,
            grid_spec=pltpu.PrefetchScalarGridSpec(
                num_scalar_prefetch=0,
                grid=(n_vtiles, B, n_stiles),
                in_specs=[
                    pl.BlockSpec((1, ts, H), lambda j, b, k: (b, k, 0)),
                    pl.BlockSpec((H, tv),    lambda j, b, k: (0, j)),
                    pl.BlockSpec((1, tv),    lambda j, b, k: (0, j)),
                    pl.BlockSpec((1, ts, 1), lambda j, b, k: (b, k, 0)),
                ],
                out_specs=[
                    pl.BlockSpec((1, ts, tv), lambda j, b, k: (b, k, j)),
                    pl.BlockSpec((1, 1, tv),  lambda j, b, k: (b, 0, j)),
                ],
            ),
            compiler_params=pltpu.CompilerParams(
                dimension_semantics=("parallel", "parallel", "arbitrary"),
                vmem_limit_bytes=vmem_limit),
            cost_estimate=cost,
        )(h_bf, w_bf, bias2d, mask3d)

    # sentence_embedding squeeze is tiny (B x V); token_embeddings returned as-is.
    return token_emb, sent_emb[:, 0, :]


# ----------------------------------------------------------------------------
# Synthetic tiny masked-LM encoder (plain JAX glue standing in for the HF model)
# ----------------------------------------------------------------------------
def layer_norm(x, g, b, eps=1e-12):
    mu = x.mean(-1, keepdims=True)
    var = ((x - mu) ** 2).mean(-1, keepdims=True)
    return (x - mu) / jnp.sqrt(var + eps) * g + b


def init_params(key, vocab, hidden, ffn, max_seq):
    ks = jax.random.split(key, 16)
    s = 0.02
    p = {
        'tok_emb': jax.random.normal(ks[0], (vocab, hidden)) * s,
        'pos_emb': jax.random.normal(ks[1], (max_seq, hidden)) * s,
        'ln_emb_g': jnp.ones((hidden,)), 'ln_emb_b': jnp.zeros((hidden,)),
        'wq': jax.random.normal(ks[2], (hidden, hidden)) * s, 'bq': jnp.zeros((hidden,)),
        'wk': jax.random.normal(ks[3], (hidden, hidden)) * s, 'bk': jnp.zeros((hidden,)),
        'wv': jax.random.normal(ks[4], (hidden, hidden)) * s, 'bv': jnp.zeros((hidden,)),
        'wo': jax.random.normal(ks[5], (hidden, hidden)) * s, 'bo': jnp.zeros((hidden,)),
        'ln1_g': jnp.ones((hidden,)), 'ln1_b': jnp.zeros((hidden,)),
        'w_ff1': jax.random.normal(ks[6], (hidden, ffn)) * s, 'b_ff1': jnp.zeros((ffn,)),
        'w_ff2': jax.random.normal(ks[7], (ffn, hidden)) * s, 'b_ff2': jnp.zeros((hidden,)),
        'ln2_g': jnp.ones((hidden,)), 'ln2_b': jnp.zeros((hidden,)),
        # MLM head transform + decoder
        'w_tr': jax.random.normal(ks[8], (hidden, hidden)) * s, 'b_tr': jnp.zeros((hidden,)),
        'ln_tr_g': jnp.ones((hidden,)), 'ln_tr_b': jnp.zeros((hidden,)),
        'w_dec': jax.random.normal(ks[9], (hidden, vocab)) * s,
        'b_dec': jnp.zeros((vocab,)),
    }
    return p


def encoder_hidden(p, input_ids, attention_mask, num_heads=4):
    B, S = input_ids.shape
    H = p['tok_emb'].shape[1]
    hd = H // num_heads
    x = p['tok_emb'][input_ids] + p['pos_emb'][jnp.arange(S)][None]
    x = layer_norm(x, p['ln_emb_g'], p['ln_emb_b'])

    def heads(t):  # (B,S,H) -> (B,nh,S,hd)
        return t.reshape(B, S, num_heads, hd).transpose(0, 2, 1, 3)

    q = heads(x @ p['wq'] + p['bq'])
    k = heads(x @ p['wk'] + p['bk'])
    v = heads(x @ p['wv'] + p['bv'])
    scores = jnp.einsum('bnqd,bnkd->bnqk', q, k) / jnp.sqrt(hd).astype(jnp.float32)
    bias = (1.0 - attention_mask.astype(jnp.float32))[:, None, None, :] * -1e9
    attn = jax.nn.softmax(scores + bias, axis=-1)
    ctx = jnp.einsum('bnqk,bnkd->bnqd', attn, v).transpose(0, 2, 1, 3).reshape(B, S, H)
    x = layer_norm(x + (ctx @ p['wo'] + p['bo']), p['ln1_g'], p['ln1_b'])
    ff = jax.nn.gelu(x @ p['w_ff1'] + p['b_ff1']) @ p['w_ff2'] + p['b_ff2']
    x = layer_norm(x + ff, p['ln2_g'], p['ln2_b'])
    # MLM head transform (dense + gelu + LN); decoder matmul runs in Pallas.
    h = layer_norm(jax.nn.gelu(x @ p['w_tr'] + p['b_tr']), p['ln_tr_g'], p['ln_tr_b'])
    return h


@jax.jit
def mlm_transformer_forward(params, input_ids, attention_mask):
    """Replicates MLMTransformer.forward + Splade_Pooling.forward."""
    h = encoder_hidden(params, input_ids, attention_mask)
    token_embeddings, sentence_embedding = splade_mlm_head(
        h, params['w_dec'], params['b_dec'], attention_mask)
    return {
        'input_ids': input_ids,
        'attention_mask': attention_mask,
        'token_embeddings': token_embeddings,
        'sentence_embedding': sentence_embedding,
    }


def _ref_splade(hidden, w_dec, b_dec, attention_mask):
    """bf16-input / f32-accumulate reference matching the kernel's precision."""
    logits = jnp.dot(hidden.astype(jnp.bfloat16), w_dec.astype(jnp.bfloat16),
                     preferred_element_type=jnp.float32) + b_dec
    sent = jnp.max(
        jnp.log1p(jnp.maximum(logits, 0.0))
        * attention_mask.astype(jnp.float32)[..., None],
        axis=1)
    return logits, sent


if __name__ == "__main__":
    B, S, H, V, FFN = 2, 8, 32, 256, 64

    key = jax.random.PRNGKey(0)
    k_param, k_ids, k_h2, k_w2, k_b2 = jax.random.split(key, 5)
    params = init_params(k_param, vocab=V, hidden=H, ffn=FFN, max_seq=S)

    input_ids = jax.random.randint(k_ids, (B, S), 0, V, dtype=jnp.int32)
    attention_mask = jnp.array(
        [[1, 1, 1, 1, 1, 1, 1, 1],
         [1, 1, 1, 1, 1, 0, 0, 0]], dtype=jnp.float32)

    feats = mlm_transformer_forward(params, input_ids, attention_mask)
    jax.block_until_ready(feats)

    # --- check 1: full forward (2-D grid path, whole seq in one tile) --------
    h = encoder_hidden(params, input_ids, attention_mask)
    ref_logits, ref_sent = _ref_splade(h, params['w_dec'], params['b_dec'],
                                       attention_mask)
    assert feats['token_embeddings'].shape == (B, S, V)
    assert feats['sentence_embedding'].shape == (B, V)
    assert jnp.allclose(feats['token_embeddings'].astype(jnp.float32),
                        ref_logits, atol=2e-2, rtol=2e-2)
    assert jnp.allclose(feats['sentence_embedding'], ref_sent,
                        atol=1e-3, rtol=1e-3)

    # --- check 2: 3-D grid path with ragged vocab/seq edges (masked writes) --
    S2, V2 = 24, 250
    h2 = jax.random.normal(k_h2, (B, S2, H), dtype=jnp.float32)
    w2 = jax.random.normal(k_w2, (H, V2), dtype=jnp.float32) * 0.05
    b2 = jax.random.normal(k_b2, (V2,), dtype=jnp.float32) * 0.05
    mask2 = jnp.concatenate(
        [jnp.ones((B, 18), jnp.float32), jnp.zeros((B, S2 - 18), jnp.float32)],
        axis=1)
    head_3d = jax.jit(functools.partial(splade_mlm_head, max_tv=128, max_ts=16))
    tok2, sent2 = head_3d(h2, w2, b2, mask2)
    jax.block_until_ready((tok2, sent2))
    ref_logits2, ref_sent2 = _ref_splade(h2, w2, b2, mask2)
    assert tok2.shape == (B, S2, V2) and sent2.shape == (B, V2)
    assert jnp.allclose(tok2.astype(jnp.float32), ref_logits2,
                        atol=3e-2, rtol=3e-2)
    assert jnp.allclose(sent2, ref_sent2, atol=2e-3, rtol=2e-3)

    print("KERNEL_OK")
</pallas_src>

<mosaic_0001>
module attributes {stable_mosaic.version = 11 : i64} {
  func.func @splade_head_kernel_2d(%arg0: i32, %arg1: i32, %arg2: memref<1x8x32xbf16, #tpu.memory_space<vmem>>, %arg3: memref<32x256xbf16, #tpu.memory_space<vmem>>, %arg4: memref<1x256xf32, #tpu.memory_space<vmem>>, %arg5: memref<1x8x1xf32, #tpu.memory_space<vmem>>, %arg6: memref<1x8x256xbf16, #tpu.memory_space<vmem>>, %arg7: memref<1x1x256xf32, #tpu.memory_space<vmem>>) attributes {dimension_semantics = [#tpu.dimension_semantics<parallel>, #tpu.dimension_semantics<parallel>], iteration_bounds = array<i64: 1, 2>, scalar_prefetch = 0 : i64, scratch_operands = 0 : i64, tpu.core_type = #tpu.core_type<tc>, window_params = [{transform_indices = @transform_0, window_bounds = array<i64: 1, 8, 32>}, {transform_indices = @transform_1, window_bounds = array<i64: 32, 256>}, {transform_indices = @transform_2, window_bounds = array<i64: 1, 256>}, {transform_indices = @transform_3, window_bounds = array<i64: 1, 8, 1>}, {transform_indices = @transform_4, window_bounds = array<i64: 1, 8, 256>}, {transform_indices = @transform_5, window_bounds = array<i64: 1, 1, 256>}]} {
    %c0 = arith.constant 0 : index
    %c0_0 = arith.constant 0 : index
    %c0_1 = arith.constant 0 : index
    %0 = vector.load %arg2[%c0, %c0_0, %c0_1] : memref<1x8x32xbf16, #tpu.memory_space<vmem>>, vector<1x8x32xbf16>
    %1 = vector.shape_cast %0 : vector<1x8x32xbf16> to vector<8x32xbf16>
    %c0_2 = arith.constant 0 : index
    %c0_3 = arith.constant 0 : index
    %2 = vector.load %arg3[%c0_2, %c0_3] : memref<32x256xbf16, #tpu.memory_space<vmem>>, vector<32x256xbf16>
    %cst = arith.constant dense<0.000000e+00> : vector<8x256xf32>
    %3 = tpu.matmul %1, %2, %cst {dimension_numbers = #tpu.dot_dimension_numbers<[1], [0], [0], [1], [0, 0, 1, 1], [], []>} : vector<8x32xbf16>, vector<32x256xbf16>, vector<8x256xf32> -> vector<8x256xf32>
    %c0_4 = arith.constant 0 : index
    %c0_5 = arith.constant 0 : index
    %4 = vector.load %arg4[%c0_4, %c0_5] : memref<1x256xf32, #tpu.memory_space<vmem>>, vector<1x256xf32>
    %5 = vector.broadcast %4 : vector<1x256xf32> to vector<8x256xf32>
    %6 = arith.addf %3, %5 : vector<8x256xf32>
    %7 = arith.truncf %6 : vector<8x256xf32> to vector<8x256xbf16>
    %c0_6 = arith.constant 0 : index
    %c0_7 = arith.constant 0 : index
    %c0_8 = arith.constant 0 : index
    %8 = vector.load %arg6[%c0_6, %c0_7, %c0_8] : memref<1x8x256xbf16, #tpu.memory_space<vmem>>, vector<1x8x256xbf16>
    %9 = vector.shape_cast %8 : vector<1x8x256xbf16> to vector<8x256xbf16>
    %10 = vector.shape_cast %7 : vector<8x256xbf16> to vector<1x8x256xbf16>
    tpu.vector_store %arg6[%c0_6, %c0_7, %c0_8], %10 {strides = array<i32>} : memref<1x8x256xbf16, #tpu.memory_space<vmem>>, vector<1x8x256xbf16>,
    %cst_9 = arith.constant 0.000000e+00 : f32
    %11 = vector.broadcast %cst_9 : f32 to vector<8x256xf32>
    %12 = arith.maximumf %6, %11 : vector<8x256xf32>
    %13 = math.log1p %12 : vector<8x256xf32>
    %c0_10 = arith.constant 0 : index
    %c0_11 = arith.constant 0 : index
    %c0_12 = arith.constant 0 : index
    %14 = vector.load %arg5[%c0_10, %c0_11, %c0_12] : memref<1x8x1xf32, #tpu.memory_space<vmem>>, vector<1x8x1xf32>
    %15 = vector.shape_cast %14 : vector<1x8x1xf32> to vector<8x1xf32>
    %16 = vector.broadcast %15 : vector<8x1xf32> to vector<8x256xf32>
    %17 = arith.mulf %13, %16 : vector<8x256xf32>
    %cst_13 = arith.constant dense<0xFF800000> : vector<256xf32>
    %18 = vector.multi_reduction <maximumf>, %17, %cst_13 [0] : vector<8x256xf32> to vector<256xf32>
    %19 = vector.shape_cast %18 : vector<256xf32> to vector<1x256xf32>
    %c0_14 = arith.constant 0 : index
    %c0_15 = arith.constant 0 : index
    %c0_16 = arith.constant 0 : index
    %20 = vector.load %arg7[%c0_14, %c0_15, %c0_16] : memref<1x1x256xf32, #tpu.memory_space<vmem>>, vector<1x1x256xf32>
    %21 = vector.shape_cast %20 : vector<1x1x256xf32> to vector<1x256xf32>
    %22 = vector.shape_cast %19 : vector<1x256xf32> to vector<1x1x256xf32>
    tpu.vector_store %arg7[%c0_14, %c0_15, %c0_16], %22 {strides = array<i32>} : memref<1x1x256xf32, #tpu.memory_space<vmem>>, vector<1x1x256xf32>,
    return
  }
  func.func @transform_0(%arg0: i32, %arg1: i32) -> (i32, i32, i32) {
    %c0_i32 = arith.constant 0 : i32
    %c0_i32_0 = arith.constant 0 : i32
    %c0_i32_1 = arith.constant 0 : i32
    return %arg1, %c0_i32, %c0_i32_0 : i32, i32, i32
  }
  func.func @transform_1(%arg0: i32, %arg1: i32) -> (i32, i32) {
    %c0_i32 = arith.constant 0 : i32
    %c0_i32_0 = arith.constant 0 : i32
    return %c0_i32, %arg0 : i32, i32
  }
  func.func @transform_2(%arg0: i32, %arg1: i32) -> (i32, i32) {
    %c0_i32 = arith.constant 0 : i32
    %c0_i32_0 = arith.constant 0 : i32
    return %c0_i32, %arg0 : i32, i32
  }
  func.func @transform_3(%arg0: i32, %arg1: i32) -> (i32, i32, i32) {
    %c0_i32 = arith.constant 0 : i32
    %c0_i32_0 = arith.constant 0 : i32
    %c0_i32_1 = arith.constant 0 : i32
    return %arg1, %c0_i32, %c0_i32_0 : i32, i32, i32
  }
  func.func @transform_4(%arg0: i32, %arg1: i32) -> (i32, i32, i32) {
    %c0_i32 = arith.constant 0 : i32
    %c0_i32_0 = arith.constant 0 : i32
    return %arg1, %c0_i32, %arg0 : i32, i32, i32
  }
  func.func @transform_5(%arg0: i32, %arg1: i32) -> (i32, i32, i32) {
    %c0_i32 = arith.constant 0 : i32
    %c0_i32_0 = arith.constant 0 : i32
    return %arg1, %c0_i32, %arg0 : i32, i32, i32
  }
}

</mosaic_0001>

<bundles_post_ra>
// kernel: mlm_transformer_forward.1
= control target key start
LH: loop header
LB: loop body
LE: loop exit
PB: predicated region body
PF: predicated region fallthrough
CT: control target
= control target key end

     0   :  { %11 = vsyncpa [#allocation3], 0  ;;  %s990_s0 = inlined_call_operand.vmem [shape: bf16[2,8,32], index: 0, kind: input, shape index: {}]   ;;  %s991_s1 = inlined_call_operand.vmem [shape: bf16[32,256], index: 1, kind: input, shape index: {}]   ;;  %s992_s2 = inlined_call_operand.vmem [shape: f32[1,256], index: 2, kind: input, shape index: {}]   ;;  %s993_s3 = inlined_call_operand.vmem [shape: f32[2,8,1], index: 3, kind: input, shape index: {}]   ;;  %s994_s4 = inlined_call_operand.hbm [shape: bf16[2,8,256], index: 4, kind: output, shape index: {0}]   ;;  %s995_s5 = inlined_call_operand.vmem [shape: f32[2,1,256], index: 5, kind: output, shape index: {1}]  }
   0x1   :  { %13 = vsyncpa [#allocation3 + $0x1], 0  ;;  %s845_s18 = smov 0   ;;  %s847_s19 = smov 0  }
   0x2   :  { %s849_s20 = smov 0   ;;  %s851_s21 = smov 0  }
   0x3   :  { %s853_s22 = smov 0   ;;  %s855_s23 = smov 0  }
   0x4 LB: > { %s640_s24 = sadd.s32 4294967295, %s810_s23   ;;  %s641_s25 = sadd.s32 4294967294, %s810_s23   ;;  %s810_s23 = sphi %s855_s23, %s19_s23   ;;  %s806_s22 = sphi %s853_s22, %s1002_s22   ;;  %s802_s21 = sphi %s851_s21, %s1001_s21   ;;  %s798_s20 = sphi %s849_s20, %s1000_s20   ;;  %s794_s19 = sphi %s847_s19, %s999_s19   ;;  %s790_s18 = sphi %s845_s18, %s998_s18  }
   0x5   : > { %s28_s26 = sadd.s32 1, %s806_s22  ;;  %s144_s27 = sadd.s32 1, %s798_s20 }
   0x6   : > { %p29_p0 = scmp.ge.s32.totalorder %s28_s26, 2  ;;  %p154_p1 = scmp.ne.s32.totalorder %s798_s20, %s794_s19 }
   0x7   : > { %p155_p2 = scmp.eq.s32.totalorder %s640_s24, 1  ;;  %p160_p3 = scmp.ne.s32.totalorder %s794_s19, %s790_s18 }
   0x8   : > { %s1004_s26 = smov (%p29_p0, %s28_s26), 0  ;;  %p161_p5 = scmp.eq.s32.totalorder %s641_s25, 1 }
   0x9   : > { %p885_p4 = por %p155_p2, %p154_p1  ;;  %s139_s29 = ssub.s32 %s806_s22, %s1004_s26 }
   0xa   : > { %p646_p6 = scmp.ge.s32.totalorder %s810_s23, 1  ;;  %p142_p7 = scmp.eq.s32.totalorder %s139_s29, 0 }
   0xb   : > { %p892_p8 = por %p161_p5, %p160_p3  ;;  %p238_p9 = scmp.lt.s32.totalorder %s810_s23, 3 }
   0xc   : > { %s898_s6 = scalar_select %p142_p7, %s798_s20, %s144_s27  }
   0xd   : > { %p239_p10 = pnand %p646_p6, %p238_p9 }
   0xe   : > { %v722_v0 = vld [vmem:[%s991_s1 + $0x4] ss:$8 sps:$4 sm:$0xff] (!%p239_p10)   ;;  %p286_p11 = scmp.lt.s32.totalorder (!%p239_p10), %s802_s21, 1  ;;  %v724_v1 = vld [vmem:[%s991_s1] ss:$8 sps:$4 sm:$0xff] (!%p239_p10)   ;;  %v812_v2 = vmov (!%p239_p10), 0   ;;  %v323_v7 = vlaneseq (!%p239_p10) }
   0xf   : > { %242 = sbr.rel (%p239_p10) target bundleno = 293 (0x125), region = 36  ;;  %389 = vmatprep.mubr.bf16.mxu0 (!%p239_p10), %v812_v2  ;;  %721 = vset.pattern.permute.xlu0 (!%p239_p10), %v812_v2  ;;  %v725_v3 = vld [vmem:[%s991_s1 + $0x14] ss:$8 sps:$4 sm:$0xff] (!%p239_p10)   ;;  %v727_v4 = vld [vmem:[%s991_s1 + $0x10] ss:$8 sps:$4 sm:$0xff] (!%p239_p10)   ;;  %vm353_vm0 = vcmask (!%p239_p10), 261120  }
  0x10   : > { %357 = vmatprep.subr.bf16.mxu0 (!%p239_p10), %v722_v0  ;;  %v925_v8 = vshrl.u32 (!%p239_p10), %v323_v7, 7  ;;  %v321_v10 = vld [vmem:[%s992_s2] sm:$0x3] (!%p239_p10)  ;;  %s273_s11 = sand.u32 (!%p239_p10), 1, %s794_s19   ;;  %s663_s14 = sshll.u32 (!%p239_p10), %s802_s21, 7 }
  0x11   : > { %358 = vmatpush1.bf16.msra.mxu0 (!%p239_p10), %v724_v1  ;;  %s647_s12 = sshll.u32 (!%p239_p10), %s273_s11, 3  ;;  %s813_s29 = smov (!%p239_p10), [#allocation2]  }
  0x12   : > { %359 = vmatprep.subr.bf16.mxu0 (!%p239_p10), %v725_v3  ;;  %v325_v9 = vsub.s32 (!%p239_p10), 0, %v925_v8  ;;  %v329_v11 = vsub.s32 (!%p239_p10), 1, %v925_v8  ;;  %s275_s15 = scalar_lea.vmem (!%p239_p10), [#allocation2], %s647_s12  ;;  %s736_s7 = sshll.u32 (!%p239_p10), %s813_s29, 4  ;;  %s737_s7 = int_to_ptr.vmem [resolvable:$false] %s736_s7 }
  0x14   : > { %v326_v12 = vrot.slane (!%p239_p10), %v321_v10, %v325_v9  ;;  %v330_v13 = vrot.slane (!%p239_p10), %v321_v10, %v329_v11 }
  0x15   : > { %360 = vmatpush1.bf16.msra.mxu0 (!%p239_p10), %v727_v4 }
  0x16   : > { %s911_s13 = scalar_select %p286_p11, %s802_s21, 1 }
  0x17   : > { %s471_s21 = scalar_lea.sflag [#allocation3], %s273_s11 }
  0x18   : > { %s648_s16 = sshll.u32 %s911_s13, 2  ;;  %s649_s27 = sshll.u32 %s911_s13, 3 }
  0x19   : > { %s289_s25 = scalar_lea.vmem %s990_s0, %s648_s16  ;;  %s304_s8 = scalar_lea.vmem %s993_s3, %s649_s27 }
  0x1a   : > { %v316_v5 = vld [vmem:[%s289_s25] sm:$0xf]  ;;  %s495_s16 = sshll.u32 %s275_s15, 4  ;;  %s937_s25 = scalar_lea.hbm %s994_s4, %s663_s14  ;;  %s939_s16 = int_to_ptr.vmem [resolvable:$true] %s495_s16 }
  0x1b   : > { %v427_v6 = vld [vmem:[%s304_s8] sm:$0xff]  ;;  %655 = vmatmul.mubr.msk.bf16.vlgmr.msra.gmra.mrb[0].mxu0 %vm353_vm0, %v316_v5  ;;  %s732_s27 = scalar_lea.vmem %s939_s16, 128  ;;  %s738_s8 = scalar_lea.vmem %s737_s7, 256 }
  0x1c   : > { %430 = vperm.xlu0 %721, %v427_v6   ;;  %p733_p12 = scmp.ne.s32.totalorder %s939_s16, %s732_s27  ;;  %p739_p1 = scmp.lt.s32.totalorder %s939_s16, %s737_s7 }
  0x1d   : > { %p740_p2 = scmp.lt.s32.totalorder %s738_s8, %s732_s27 }
  0x1e   : > { %p734_p13 = pnand %p733_p12, %p885_p4 }
  0x1f   : > { %p741_p3 = por %p740_p2, %p739_p1 }
  0x20   : > { %p735_p0 = pneg %p734_p13 }
  0x22   : > { %p742_p5 = pnand %p741_p3, %p735_p0 }
  0xee   : > { %v391_v14 = vpop.f32.mrb[0].mxu0 }
  0xef   : > { %v392_v15 = vadd.f32 %v391_v14, %v326_v12  ;;  %v393_v16 = vpop.f32.mrb[1].mxu0 }
  0xf0   : > { %v394_v17 = vadd.f32 %v393_v16, %v330_v13  ;;  %v395_v18 = vpop.f32.mrb[2].mxu0 }
  0xf1   : > { %v407_v19 = vmax.f32 %v392_v15, 0.0  ;;  %v396_v20 = vpop.f32.mrb[3].mxu0 }
  0xf2   : > { %v662_v21 = vpack.c.bf16 %v394_v17, %v392_v15  ;;  %v408_v22 = vmax.f32 %v394_v17, 0.0 }
  0xf3   : > { %v409_v23 = vadd.f32 1.0, %v407_v19 }
  0xf4   : > { %v418_v24 = vadd.f32 1.0, %v408_v22  ;;  %406 = vst [vmem:[%s275_s15] sm:$0xff] %v662_v21 }
  0xf5   : > { %728 = vlog2.f32 %v409_v23 }
  0xf6   : > { %745 = shalt.err (!%p742_p5)
}
  0xf7   : > { %s746_s9 = scalar_lea.hbm %s937_s25, 128  ;;  %s750_s12 = scalar_lea.hbm %s994_s4, 256 }
  0xf8   : > { %p747_p6 = scmp.ne.s32.totalorder %s937_s25, %s746_s9  ;;  %p751_p10 = scmp.lt.u32.totalorder %s937_s25, %s994_s4 }
  0xf9   : > { %p752_p11 = scmp.lt.u32.totalorder %s750_s12, %s746_s9  ;;  %p754_p13 = scmp.lt.u32.totalorder %s746_s9, %s937_s25 }
  0xfa   : > { %p748_p7 = pnand %p747_p6, %p885_p4 }
  0xfb   : > { %p753_p12 = por %p752_p11, %p751_p10 }
  0xfc   : > { %p749_p9 = pneg %p748_p7 }
  0xfd   : > { %p755_p0 = por %p754_p13, %p753_p12 }
  0xff   : > { %p756_p1 = pnand %p755_p0, %p749_p9 }
 0x101   : > { %759 = shalt.err (!%p756_p1)
}
 0x102   : > { %664 = dma.vmem_to_hbm [thread:$0]  (%p885_p4), %s939_s16, 128, %s937_s25, %s471_s21   ;;  %730 = vlog2.f32 %v418_v24  ;;  %v412_v25 = vmul.f32 -0.5, %v407_v19  ;;  %v421_v26 = vmul.f32 -0.5, %v408_v22  ;;  %v415_v28 = vand.u32 2147483647, %v407_v19  ;;  %v729_v31 = vpop.eup %728  ;;  %v431_v33 = vpop.permute.xlu0 %430 }
 0x103   : > { %v424_v30 = vand.u32 2147483647, %v408_v22  ;;  %v411_v34 = vmul.f32 0.6931472, %v729_v31  ;;  %v814_v45 = vmov 1966171168  }
 0x104   : > { %v413_v27 = vadd.f32 1.0, %v412_v25  ;;  %v422_v29 = vadd.f32 1.0, %v421_v26  ;;  %vm416_vm1 = vcmp.lt.f32.partialorder %v415_v28, 0.0004427343  ;;  %v451_v46 = vunpack.c.l.s4 %v814_v45  ;;  %s650_s28 = sshll.u32 %s911_s13, 1 }
 0x105   : > { %vm425_vm2 = vcmp.lt.f32.partialorder %v424_v30, 0.0004427343  ;;  %s313_s24 = scalar_lea.vmem %s995_s5, %s650_s28  ;;  %vm467_vm3 = vcmp.lt.s32.totalorder %v323_v7, 256 }
 0x106   : > { %v414_v35 = vmul.f32 %v413_v27, %v407_v19  ;;  %v423_v37 = vmul.f32 %v422_v29, %v408_v22  ;;  %v452_v51 = vunpack.c.0.s8 %v451_v46 }
 0x108   : > { %v417_v38 = vsel %vm416_vm1, %v414_v35, %v411_v34  ;;  %v455_v56 = vsub.s32 %v452_v51, %v925_v8 }
 0x109   : > { %v433_v40 = vmul.f32 %v431_v33, %v417_v38 }
 0x10b   : > { %v435_v42 = vrot.slane %v433_v40, 4 }
 0x10c   : > { %v731_v32 = vpop.eup %730 }
 0x10d   : > { %v420_v36 = vmul.f32 0.6931472, %v731_v32  ;;  %v436_v44 = vmax.f32 %v433_v40, %v435_v42 }
 0x10f   : > { %v426_v39 = vsel %vm425_vm2, %v423_v37, %v420_v36  ;;  %v437_v48 = vrot.slane %v436_v44, 2 }
 0x110   : > { %v434_v41 = vmul.f32 %v431_v33, %v426_v39 }
 0x111   : > { %v438_v50 = vmax.f32 %v436_v44, %v437_v48 }
 0x112   : > { %v441_v43 = vrot.slane %v434_v41, 4 }
 0x113   : > { %v439_v53 = vrot.slane %v438_v50, 1 }
 0x114   : > { %v442_v47 = vmax.f32 %v434_v41, %v441_v43 }
 0x115   : > { %v440_v55 = vmax.f32 %v438_v50, %v439_v53 }
 0x116   : > { %v443_v49 = vrot.slane %v442_v47, 2 }
 0x118   : > { %v444_v52 = vmax.f32 %v442_v47, %v443_v49 }
 0x11a   : > { %v445_v54 = vrot.slane %v444_v52, 1 }
 0x11c   : > { %v446_v57 = vmax.f32 %v444_v52, %v445_v54 }
 0x11e   : > { %v449_v58 = vcombine.low %v440_v55, %v446_v57 }
 0x120   : > { %v456_v59 = vrot.slane %v449_v58, %v455_v56 }
 0x122   : > { %v463_v60 = vrot.slane %v456_v59, %v455_v56 }
 0x124   : > { %469 = vst.msk [vmem:[%s313_s24] sm:$0x3] %vm467_vm3, %v463_v60 }
 0x125 PF: > { %p670_p4 = scmp.ge.s32.totalorder %s810_s23, 2  ;;  %s511_s25 = sand.u32 1, %s790_s18  }
 0x126   : > { %s512_s21 = scalar_lea.sflag [#allocation3], %s511_s25 }
 0x127   : > { %p667_p2 = pnand %p670_p4, %p892_p8 }
 0x129   : > { %785 = dma.done.wait (!%p667_p2), %s512_s21, 128  }
 0x12a   : > { %787 = vsyncadd (!%p667_p2), %s512_s21, 4294967168  ;;  %s19_s23 = sadd.s32 1, %s810_s23   ;;  %s998_s18 = smov %s794_s19 }
 0x12b   : > { %p16_p3 = scmp.ge.s32.totalorder %s19_s23, 4   ;;  %s999_s19 = smov %s798_s20 }
 0x12c   : > { %s1000_s20 = smov %s898_s6  ;;  %s1001_s21 = smov %s806_s22 }
 0x12d   : > { %s1002_s22 = smov %s1004_s26  ;;  %18 = sbr.rel (!%p16_p3) target bundleno = 4 (0x4), region = 92 }
 0x134   :  { %528 = vsyncpa [#allocation3], 1 }
 0x135   :  { %530 = vsyncpa [#allocation3 + $0x1], 1 }

</bundles_post_ra>
